<compile_context>
chip_gen: v7x
topology: tpu7x:2x2x1
jax: 0.10.0
libtpu: 0.0.40
codegen_flags: <defaults>
</compile_context>

<pallas_src>
import functools

import numpy as np
import jax
import jax.numpy as jnp
from jax import lax
from jax.experimental import pallas as pl
from jax.experimental.pallas import tpu as pltpu


# --------------------------------------------------------------------------
# Gene tree definition (deterministic quadrant order).
# --------------------------------------------------------------------------
sub_tree_identifier = {'00', '01', '11', '10'}
branch_id_list = ['00', '01', '10', '11']


class GeneNode:
    def __init__(self, is_sensor, data=None, branch=None):
        self.is_sensor = is_sensor
        self.data = data                       # 'max' or 'avg' for sensor (leaf) nodes
        self.branch = branch if branch is not None else {b: None for b in branch_id_list}


def _round_up(a, b):
    return -(-a // b) * b


# --------------------------------------------------------------------------
# Static tree walk: collect leaf windows + output placement (mirrors the
# torch.cat structure of the reference forward).
# Each leaf record: (r0, c0, size, out_r0, out_c0, out_h, out_w, mode).
# --------------------------------------------------------------------------
def _collect_leaves(node, r0, c0, size, k, s):
    if node.is_sensor:
        assert node.data in ('max', 'avg'), f"unsupported pooling mode {node.data!r}"
        o = (size - k) // s + 1
        assert o >= 1, "leaf window smaller than pooling kernel"
        return [(r0, c0, size, 0, 0, o, o, node.data)], (o, o)

    half = size // 2
    for b in branch_id_list:
        assert node.branch.get(b) is not None, \
            "internal gene nodes must have all four branches (torch.cat would fail otherwise)"

    l00, (h00, w00) = _collect_leaves(node.branch['00'], r0, c0, half, k, s)
    l01, (h01, w01) = _collect_leaves(node.branch['01'], r0, c0 + half, half, k, s)
    l10, (h10, w10) = _collect_leaves(node.branch['10'], r0 + half, c0, half, k, s)
    l11, (h11, w11) = _collect_leaves(node.branch['11'], r0 + half, c0 + half, half, k, s)

    # concat compatibility (same requirement torch.cat enforces)
    assert h00 == h01 and h10 == h11 and (w00 + w01) == (w10 + w11)

    def shift(ls, dr, dc):
        return [(a, b_, sz, orr + dr, occ + dc, lh, lw, m)
                for (a, b_, sz, orr, occ, lh, lw, m) in ls]

    leaves = (shift(l00, 0, 0) + shift(l01, 0, w00) +
              shift(l10, h00, 0) + shift(l11, h00, w10))
    return leaves, (h00 + h10, w00 + w01)


# --------------------------------------------------------------------------
# Trace-time selection-matrix construction (numpy constants, hoisted out of
# the kernel entirely — review: "hoist and dedupe selection-matrix work").
#   out_flat[:, q] = reduce_{mode(q)} over t in [0,k*k) of x_flat[:, in_idx(q,t)]
# --------------------------------------------------------------------------
def _build_selection_matrices(leaves, W, Wo_t, Qp, k, s, modes):
    # W: input width; Wo_t: assembled output width; Qp: padded column count.
    k2 = k * k
    HW = None  # filled by caller via shapes; matrices sized (H*W, Qp)
    savg = None
    smax = None

    def ensure(shape_rows):
        nonlocal savg, smax
        if 'avg' in modes and savg is None:
            savg = np.zeros((shape_rows, Qp), np.float32)
        if 'max' in modes and smax is None:
            smax = np.zeros((k2, shape_rows, Qp), np.float32)

    for (r0, c0, sz, or0, oc0, lh, lw, mode) in leaves:
        ensure(W * W if HW is None else HW)  # square input (H == W)
        oi = np.arange(lh)[:, None]                        # (lh, 1)
        oj = np.arange(lw)[None, :]                        # (1, lw)
        q = ((or0 + oi) * Wo_t + (oc0 + oj)).reshape(-1)   # flat output positions
        in_r = r0 + s * oi                                  # (lh, 1) window top rows
        in_c = c0 + s * oj                                  # (1, lw) window left cols
        for ki in range(k):
            for kj in range(k):
                t = ki * k + kj
                flat = ((in_r + ki) * W + (in_c + kj)).reshape(-1)
                if mode == 'max':
                    smax[t, flat, q] = 1.0      # one-hot per column
                else:
                    savg[flat, q] = 1.0         # 0/1 sum matrix (1/k^2 applied in-kernel)
    return savg, smax


# --------------------------------------------------------------------------
# Fused kernel: one block of planes; all matmuls against constant selection
# matrices held in VMEM.  No reshapes, transposes, or sub-lane/lane slicing.
# --------------------------------------------------------------------------
def _genetic_pool_kernel(x_ref, *rest, k2, inv_kk, has_avg, has_max):
    idx = 0
    savg_ref = None
    smax_ref = None
    if has_avg:
        savg_ref = rest[idx]; idx += 1
    if has_max:
        smax_ref = rest[idx]; idx += 1
    o_ref = rest[idx]

    x = x_ref[0]                                       # (b_blk, H*W)

    acc = None
    if has_max:
        # k*k independent one-hot matmuls, incrementally maxed on the VPU.
        # Avg-mode columns are all-zero in every matrix -> contribute exactly 0.
        for t in range(k2):
            p = jnp.dot(x, smax_ref[t], preferred_element_type=jnp.float32)
            acc = p if acc is None else jnp.maximum(acc, p)
    if has_avg:
        a = jnp.dot(x, savg_ref[...], preferred_element_type=jnp.float32)
        a = a * inv_kk                                  # scalar VPU multiply (review item)
        acc = a if acc is None else acc + a             # max cols are 0 in `a` -> plain add

    o_ref[0] = acc.astype(o_ref.dtype)                  # lane-dense (Qp % 128 == 0) store


# --------------------------------------------------------------------------
# Wrapper: one pallas_call for the whole forward.
# --------------------------------------------------------------------------
def genetic_pool_pallas(x, gene, kernel_size, stride):
    N, C, H, W = x.shape
    assert H == W, "GeneticPool reference semantics assume square spatial dims"
    k, s = int(kernel_size), int(stride)

    leaves, (Ho_t, Wo_t) = _collect_leaves(gene, 0, 0, W, k, s)
    leaves = tuple(leaves)
    modes = {lf[7] for lf in leaves}

    NC = N * C
    HW = H * W
    Q = Ho_t * Wo_t
    Qp = _round_up(Q, 128)               # padded output columns -> unmasked vst
    k2 = k * k

    out_dtype = x.dtype
    compute_dtype = jnp.bfloat16 if x.dtype == jnp.bfloat16 else jnp.float32
    xf = x.reshape(NC, HW)
    if xf.dtype != compute_dtype:
        xf = xf.astype(compute_dtype)
    itemsize = jnp.dtype(compute_dtype).itemsize

    # Selection-matrix VMEM footprint guard (flattened selection scales as
    # H^2*W^2/k^2; fine for the small feature maps this module targets).
    mat_bytes = ((HW * Qp * itemsize) if 'avg' in modes else 0) + \
                ((k2 * HW * Qp * itemsize) if 'max' in modes else 0)
    if mat_bytes > 20 * 2**20:
        # TODO(synk): add a separable (W-pool then H-pool) two-stage path for large spatial maps.
        raise NotImplementedError(
            "genetic_pool_pallas: spatial dims too large for the flattened "
            f"selection-matmul path ({mat_bytes>>20} MiB of selection matrices)")

    savg_np, smax_np = _build_selection_matrices(leaves, W, Wo_t, Qp, k, s, modes)

    # ---- block sizing -----------------------------------------------------
    hw_pad = _round_up(HW, 128)
    input_budget = 12 * 2**20                              # >= old 4 MiB cap (review)
    cap_rows = max(1, input_budget // (hw_pad * itemsize))
    b_blk = min(NC, cap_rows)
    if NC >= 2:
        b_blk = min(b_blk, -(-NC // 2))    # >= 2 grid steps so v7x's 2 TCs both work
    if b_blk >= 8:
        b_blk -= b_blk % 8                 # sublane-dense blocks when possible
    b_blk = max(1, b_blk)
    NC_pad = _round_up(NC, b_blk)          # never hostage to divisibility: pad planes
    G = NC_pad // b_blk

    if NC_pad > NC:
        xf = jnp.pad(xf, ((0, NC_pad - NC), (0, 0)))
    xg = xf.reshape(G, b_blk, HW)          # contiguous -> free reshape; last two dims
                                           # of every block equal the full array dims.

    # ---- VMEM budget / compiler params -------------------------------------
    rows_pad = _round_up(b_blk, 8)
    vmem_need = (2 * rows_pad * hw_pad * itemsize            # double-buffered input block
                 + 2 * rows_pad * Qp * itemsize              # double-buffered output block
                 + 2 * mat_bytes                             # selection constants
                 + 3 * rows_pad * Qp * 4)                    # f32 intermediates / accumulator
    vmem_limit = int(min(48 * 2**20, max(24 * 2**20, 2 * vmem_need)))

    # ---- assemble pallas_call ----------------------------------------------
    mat_args = []
    mat_specs = []
    if savg_np is not None:
        mat_args.append(jnp.asarray(savg_np, dtype=compute_dtype))
        mat_specs.append(pl.BlockSpec((HW, Qp), lambda i: (0, 0)))          # fetched once
    if smax_np is not None:
        mat_args.append(jnp.asarray(smax_np, dtype=compute_dtype))
        mat_specs.append(pl.BlockSpec((k2, HW, Qp), lambda i: (0, 0, 0)))   # fetched once

    kern = functools.partial(
        _genetic_pool_kernel,
        k2=k2, inv_kk=1.0 / float(k2),
        has_avg=savg_np is not None, has_max=smax_np is not None)

    out = pl.pallas_call(
        kern,
        out_shape=jax.ShapeDtypeStruct((G, b_blk, Qp), out_dtype),
        grid=(G,),
        in_specs=[pl.BlockSpec((1, b_blk, HW), lambda i: (i, 0, 0))] + mat_specs,
        out_specs=pl.BlockSpec((1, b_blk, Qp), lambda i: (i, 0, 0)),
        compiler_params=pltpu.CompilerParams(
            dimension_semantics=("parallel",),   # shards plane blocks across v7x's 2 TCs
            vmem_limit_bytes=vmem_limit),
    )(xg, *mat_args)

    out = out.reshape(NC_pad, Qp)[:NC, :Q]
    return out.reshape(N, C, Ho_t, Wo_t)


class GeneticPool:
    """JAX/Pallas port of the PyTorch GeneticPool module (forward only)."""

    def __init__(self, kernel_size, stride, gene, padding=0):
        self.kernel_size = kernel_size
        self.stride = stride
        self.padding = padding   # stored but unused, exactly like the reference forward
        self.gene = gene

    def __call__(self, x):
        return genetic_pool_pallas(x, self.gene, self.kernel_size, self.stride)


# --------------------------------------------------------------------------
# Pure-JAX reference (mirrors the torch control flow) for correctness check.
# --------------------------------------------------------------------------
def _ref_pool2d(x, k, s, mode):
    if mode == 'max':
        return lax.reduce_window(x, -jnp.inf, lax.max,
                                 (1, 1, k, k), (1, 1, s, s), 'VALID')
    summed = lax.reduce_window(x, 0.0, lax.add,
                               (1, 1, k, k), (1, 1, s, s), 'VALID')
    return summed / float(k * k)


def _ref_address_pooling(node, x, full, k, s):
    if node.is_sensor:
        return _ref_pool2d(x, k, s, node.data)
    half = full // 2
    d00 = _ref_address_pooling(node.branch['00'], x[:, :, :half, :half], half, k, s)
    d01 = _ref_address_pooling(node.branch['01'], x[:, :, :half, half:], half, k, s)
    d10 = _ref_address_pooling(node.branch['10'], x[:, :, half:, :half], half, k, s)
    d11 = _ref_address_pooling(node.branch['11'], x[:, :, half:, half:], half, k, s)
    top = jnp.concatenate((d00, d01), axis=-1)
    bot = jnp.concatenate((d10, d11), axis=-1)
    return jnp.concatenate((top, bot), axis=2)


# --------------------------------------------------------------------------
if __name__ == "__main__":
    key = jax.random.PRNGKey(0)
    x = jax.random.normal(key, (2, 4, 16, 16), dtype=jnp.float32)

    leaf = lambda m: GeneNode(is_sensor=True, data=m)
    inner_10 = GeneNode(is_sensor=False,
                        branch={'00': leaf('max'), '01': leaf('avg'),
                                '10': leaf('max'), '11': leaf('avg')})
    gene = GeneNode(is_sensor=False,
                    branch={'00': leaf('max'), '01': leaf('avg'),
                            '10': inner_10, '11': leaf('max')})

    module = GeneticPool(kernel_size=2, stride=2, gene=gene)
    out = jax.block_until_ready(module(x))
    assert out.shape == (2, 4, 8, 8), out.shape

    ref = jax.block_until_ready(_ref_address_pooling(gene, x, x.shape[-1], 2, 2))
    np.testing.assert_allclose(np.asarray(out), np.asarray(ref), rtol=1e-5, atol=1e-5)
    print("KERNEL_OK")
</pallas_src>

<mosaic_0001>
module attributes {stable_mosaic.version = 11 : i64} {
  func.func @_genetic_pool_kernel(%arg0: i32, %arg1: memref<1x4x256xf32, #tpu.memory_space<vmem>>, %arg2: memref<256x128xf32, #tpu.memory_space<vmem>>, %arg3: memref<4x256x128xf32, #tpu.memory_space<vmem>>, %arg4: memref<1x4x128xf32, #tpu.memory_space<vmem>>) attributes {dimension_semantics = [#tpu.dimension_semantics<parallel>], iteration_bounds = array<i64: 2>, scalar_prefetch = 0 : i64, scratch_operands = 0 : i64, tpu.core_type = #tpu.core_type<tc>, window_params = [{transform_indices = @transform_0, window_bounds = array<i64: 1, 4, 256>}, {pipeline_mode = #tpu.pipeline_mode<synchronous>, transform_indices = @transform_1, window_bounds = array<i64: 256, 128>}, {pipeline_mode = #tpu.pipeline_mode<synchronous>, transform_indices = @transform_2, window_bounds = array<i64: 4, 256, 128>}, {transform_indices = @transform_3, window_bounds = array<i64: 1, 4, 128>}]} {
    %c0 = arith.constant 0 : index
    %c0_0 = arith.constant 0 : index
    %c0_1 = arith.constant 0 : index
    %0 = vector.load %arg1[%c0, %c0_0, %c0_1] : memref<1x4x256xf32, #tpu.memory_space<vmem>>, vector<1x4x256xf32>
    %1 = vector.shape_cast %0 : vector<1x4x256xf32> to vector<4x256xf32>
    %c0_2 = arith.constant 0 : index
    %c0_3 = arith.constant 0 : index
    %c0_4 = arith.constant 0 : index
    %2 = vector.load %arg3[%c0_2, %c0_3, %c0_4] : memref<4x256x128xf32, #tpu.memory_space<vmem>>, vector<1x256x128xf32>
    %3 = vector.shape_cast %2 : vector<1x256x128xf32> to vector<256x128xf32>
    %cst = arith.constant dense<0.000000e+00> : vector<4x128xf32>
    %4 = tpu.matmul %1, %3, %cst {dimension_numbers = #tpu.dot_dimension_numbers<[1], [0], [0], [1], [0, 0, 1, 1], [], []>} : vector<4x256xf32>, vector<256x128xf32>, vector<4x128xf32> -> vector<4x128xf32>
    %c1 = arith.constant 1 : index
    %c0_5 = arith.constant 0 : index
    %c0_6 = arith.constant 0 : index
    %5 = vector.load %arg3[%c1, %c0_5, %c0_6] : memref<4x256x128xf32, #tpu.memory_space<vmem>>, vector<1x256x128xf32>
    %6 = vector.shape_cast %5 : vector<1x256x128xf32> to vector<256x128xf32>
    %cst_7 = arith.constant dense<0.000000e+00> : vector<4x128xf32>
    %7 = tpu.matmul %1, %6, %cst_7 {dimension_numbers = #tpu.dot_dimension_numbers<[1], [0], [0], [1], [0, 0, 1, 1], [], []>} : vector<4x256xf32>, vector<256x128xf32>, vector<4x128xf32> -> vector<4x128xf32>
    %8 = arith.maximumf %4, %7 : vector<4x128xf32>
    %c2 = arith.constant 2 : index
    %c0_8 = arith.constant 0 : index
    %c0_9 = arith.constant 0 : index
    %9 = vector.load %arg3[%c2, %c0_8, %c0_9] : memref<4x256x128xf32, #tpu.memory_space<vmem>>, vector<1x256x128xf32>
    %10 = vector.shape_cast %9 : vector<1x256x128xf32> to vector<256x128xf32>
    %cst_10 = arith.constant dense<0.000000e+00> : vector<4x128xf32>
    %11 = tpu.matmul %1, %10, %cst_10 {dimension_numbers = #tpu.dot_dimension_numbers<[1], [0], [0], [1], [0, 0, 1, 1], [], []>} : vector<4x256xf32>, vector<256x128xf32>, vector<4x128xf32> -> vector<4x128xf32>
    %12 = arith.maximumf %8, %11 : vector<4x128xf32>
    %c3 = arith.constant 3 : index
    %c0_11 = arith.constant 0 : index
    %c0_12 = arith.constant 0 : index
    %13 = vector.load %arg3[%c3, %c0_11, %c0_12] : memref<4x256x128xf32, #tpu.memory_space<vmem>>, vector<1x256x128xf32>
    %14 = vector.shape_cast %13 : vector<1x256x128xf32> to vector<256x128xf32>
    %cst_13 = arith.constant dense<0.000000e+00> : vector<4x128xf32>
    %15 = tpu.matmul %1, %14, %cst_13 {dimension_numbers = #tpu.dot_dimension_numbers<[1], [0], [0], [1], [0, 0, 1, 1], [], []>} : vector<4x256xf32>, vector<256x128xf32>, vector<4x128xf32> -> vector<4x128xf32>
    %16 = arith.maximumf %12, %15 : vector<4x128xf32>
    %c0_14 = arith.constant 0 : index
    %c0_15 = arith.constant 0 : index
    %17 = vector.load %arg2[%c0_14, %c0_15] : memref<256x128xf32, #tpu.memory_space<vmem>>, vector<256x128xf32>
    %cst_16 = arith.constant dense<0.000000e+00> : vector<4x128xf32>
    %18 = tpu.matmul %1, %17, %cst_16 {dimension_numbers = #tpu.dot_dimension_numbers<[1], [0], [0], [1], [0, 0, 1, 1], [], []>} : vector<4x256xf32>, vector<256x128xf32>, vector<4x128xf32> -> vector<4x128xf32>
    %cst_17 = arith.constant 2.500000e-01 : f32
    %19 = vector.broadcast %cst_17 : f32 to vector<4x128xf32>
    %20 = arith.mulf %18, %19 : vector<4x128xf32>
    %21 = arith.addf %16, %20 : vector<4x128xf32>
    %c0_18 = arith.constant 0 : index
    %c0_19 = arith.constant 0 : index
    %c0_20 = arith.constant 0 : index
    %22 = vector.load %arg4[%c0_18, %c0_19, %c0_20] : memref<1x4x128xf32, #tpu.memory_space<vmem>>, vector<1x4x128xf32>
    %23 = vector.shape_cast %22 : vector<1x4x128xf32> to vector<4x128xf32>
    %24 = vector.shape_cast %21 : vector<4x128xf32> to vector<1x4x128xf32>
    tpu.vector_store %arg4[%c0_18, %c0_19, %c0_20], %24 {strides = array<i32>} : memref<1x4x128xf32, #tpu.memory_space<vmem>>, vector<1x4x128xf32>,
    return
  }
  func.func @transform_0(%arg0: i32) -> (i32, i32, i32) {
    %c0_i32 = arith.constant 0 : i32
    %c0_i32_0 = arith.constant 0 : i32
    %c0_i32_1 = arith.constant 0 : i32
    return %arg0, %c0_i32, %c0_i32_0 : i32, i32, i32
  }
  func.func @transform_1(%arg0: i32) -> (i32, i32) {
    %c0_i32 = arith.constant 0 : i32
    %c0_i32_0 = arith.constant 0 : i32
    %c0_i32_1 = arith.constant 0 : i32
    return %c0_i32, %c0_i32_0 : i32, i32
  }
  func.func @transform_2(%arg0: i32) -> (i32, i32, i32) {
    %c0_i32 = arith.constant 0 : i32
    %c0_i32_0 = arith.constant 0 : i32
    %c0_i32_1 = arith.constant 0 : i32
    %c0_i32_2 = arith.constant 0 : i32
    return %c0_i32, %c0_i32_0, %c0_i32_1 : i32, i32, i32
  }
  func.func @transform_3(%arg0: i32) -> (i32, i32, i32) {
    %c0_i32 = arith.constant 0 : i32
    %c0_i32_0 = arith.constant 0 : i32
    %c0_i32_1 = arith.constant 0 : i32
    return %arg0, %c0_i32, %c0_i32_0 : i32, i32, i32
  }
}

</mosaic_0001>

<bundles_post_ra>
// kernel: tpu_custom_call.1
= control target key start
LH: loop header
LB: loop body
LE: loop exit
PB: predicated region body
PF: predicated region fallthrough
CT: control target
= control target key end

     0   :  { %8 = vsyncpa [#allocation3], 0  ;;  %s1698_s0 = inlined_call_operand.hbm [shape: f32[2,4,256], index: 0, kind: input, shape index: {}]   ;;  %s1699_s1 = inlined_call_operand.hbm [shape: f32[256,128], index: 1, kind: input, shape index: {}]   ;;  %s1700_s2 = inlined_call_operand.hbm [shape: f32[4,256,128], index: 2, kind: input, shape index: {}]   ;;  %s1701_s3 = inlined_call_operand.hbm [shape: f32[2,4,128], index: 3, kind: output, shape index: {}]  }
   0x1   :  { %10 = vsyncpa [#allocation3 + $0x1], 0 }
   0x2   :  { %11 = vsyncpa [#allocation6], 0 }
   0x3   :  { %12 = vsyncpa [#allocation4], 0 }
   0x4   :  { %14 = vsyncpa [#allocation4 + $0x1], 0  ;;  %s1449_s12 = smov 0   ;;  %s1451_s13 = smov 0  }
   0x5   :  { %s1453_s14 = smov 0   ;;  %s1455_s15 = smov 0  }
   0x6 LB: > { %s1470_s16 = sadd.s32 4294967295, %s1421_s15   ;;  %s842_s17 = sadd.s32 4294967294, %s1421_s15   ;;  %s1421_s15 = sphi %s1455_s15, %s1721_s15   ;;  %s1417_s14 = sphi %s1453_s14, %s1720_s14   ;;  %s1413_s13 = sphi %s1451_s13, %s1719_s13   ;;  %s1409_s12 = sphi %s1449_s12, %s1718_s12  }
   0x7   : > { %p40_p0 = scmp.ne.s32.totalorder %s1413_s13, %s1409_s12  ;;  %p1702_p1 = scmp.eq.s32.totalorder %s1470_s16, 0 }
   0x8   : > { %p112_p3 = scmp.eq.s32.totalorder %s842_s17, 1  ;;  %p843_p5 = scmp.ge.s32.totalorder %s1421_s15, 1 }
   0x9   : > { %p1479_p4 = por %p1702_p1, %p40_p0  ;;  %p119_p7 = scmp.lt.s32.totalorder %s1421_s15, 3 }
   0xa   : > { %p1484_p6 = por %p112_p3, %p40_p0  ;;  %s1423_s21 = smov [#allocation5]  }
   0xb   : > { %s1705_s18 = scalar_select %p1479_p4, 1, 0 }
   0xc   : > { %s1706_s19 = scalar_select %p1484_p6, 1, 0 }
   0xd   : > { %p1489_p8 = pnand %p843_p5, %p119_p7  ;;  %s131_s22 = sshll.u32 %s1423_s21, 4  ;;  %s1493_s22 = int_to_ptr.vmem [resolvable:$true] %s131_s22 }
   0xe   : > { %s1424_s24 = smov [#allocation7]   ;;  %s1265_s28 = scalar_lea.hbm %s1699_s1, 4096 }
   0xf   : > { %p1207_p9 = pneg %p1489_p8  ;;  %s144_s25 = sshll.u32 %s1424_s24, 4  ;;  %s1504_s25 = int_to_ptr.vmem [resolvable:$true] %s144_s25 }
  0x10   : > { %p1266_p12 = scmp.ne.s32.totalorder %s1699_s1, %s1265_s28  ;;  %p1272_p5 = scmp.lt.u32.totalorder %s1265_s28, %s1699_s1 }
  0x11   : > { %p1500_p11 = pnand %p1207_p9, %p1702_p1 }
  0x13   : > { %p1267_p13 = pneg %p1500_p11 }
  0x15   : > { %p1268_p0 = pnand %p1267_p13, %p1266_p12 }
  0x17   : > { %p1269_p3 = pneg %p1268_p0 }
  0x19   : > { %p1274_p7 = pnand %p1272_p5, %p1269_p3 }
  0x1b   : > { %1277 = shalt.err (!%p1274_p7)
}
  0x1c   : > { %s1278_s6 = scalar_lea.vmem %s1493_s22, 4096  ;;  %p1286_p2 = scmp.lt.s32.totalorder %s1493_s22, %s1493_s22 }
  0x1d   : > { %p1279_p9 = scmp.ne.s32.totalorder %s1493_s22, %s1278_s6  ;;  %p1287_p12 = scmp.lt.s32.totalorder %s1278_s6, %s1278_s6 }
  0x1f   : > { %p1281_p10 = pnand %p1279_p9, %p1267_p13  ;;  %p1288_p0 = por %p1287_p12, %p1286_p2 }
  0x21   : > { %p1282_p1 = pneg %p1281_p10 }
  0x23   : > { %p1289_p6 = pnand %p1288_p0, %p1282_p1 }
  0x25   : > { %1292 = shalt.err (!%p1289_p6)
}
  0x26   : > { %s1425_s7 = smov 128   ;;  %s1426_s8 = smov 8  }
  0x27   : > { %1210 = dma.hbm_to_vmem [thread:$0]  (!%p1500_p11), %s1699_s1, 4096, %s1493_s22, [#allocation6], %s1425_s7, %s1425_s7, %s1426_s8  }
  0x28   : > { %s1293_s21 = scalar_lea.hbm %s1700_s2, 16384 }
  0x29   : > { %p1294_p2 = scmp.ne.s32.totalorder %s1700_s2, %s1293_s21  ;;  %p1300_p10 = scmp.lt.u32.totalorder %s1293_s21, %s1700_s2 }
  0x2b   : > { %p1296_p1 = pnand %p1294_p2, %p1267_p13 }
  0x2d   : > { %p1297_p6 = pneg %p1296_p1 }
  0x2f   : > { %p1302_p3 = pnand %p1300_p10, %p1297_p6 }
  0x31   : > { %1305 = shalt.err (!%p1302_p3)
}
  0x32   : > { %s1306_s22 = scalar_lea.vmem %s1504_s25, 16384  ;;  %p1314_p12 = scmp.lt.s32.totalorder %s1504_s25, %s1504_s25 }
  0x33   : > { %p1307_p5 = scmp.ne.s32.totalorder %s1504_s25, %s1306_s22  ;;  %p1315_p0 = scmp.lt.s32.totalorder %s1306_s22, %s1306_s22 }
  0x35   : > { %p1309_p7 = pnand %p1307_p5, %p1267_p13  ;;  %p1316_p2 = por %p1315_p0, %p1314_p12 }
  0x37   : > { %p1310_p9 = pneg %p1309_p7 }
  0x39   : > { %p1317_p1 = pnand %p1316_p2, %p1310_p9 }
  0x3b   : > { %1320 = shalt.err (!%p1317_p1)
}
  0x3c   : > { %1213 = dma.hbm_to_vmem [thread:$0]  (!%p1500_p11), %s1700_s2, 16384, %s1504_s25, [#allocation6], %s1425_s7, %s1425_s7, %s1426_s8  }
  0x3d   : > { %s1559_s4 = sadd.s32 1, %s1421_s15   ;;  %s27_s23 = sadd.s32 1, %s1417_s14 }
  0x3e   : > { %s24_s5 = ssub.s32 %s1421_s15, %s1559_s4  ;;  %p34_p13 = scmp.ne.s32.totalorder %s1417_s14, %s1413_s13 }
  0x3f   : > { %p25_p6 = scmp.eq.s32.totalorder %s24_s5, 0  ;;  %p35_p10 = scmp.eq.s32.totalorder %s1421_s15, 0 }
  0x40   : > { %p1709_p3 = scmp.eq.s32.totalorder %s1470_s16, 1  ;;  %p1224_p7 = scmp.lt.s32.totalorder %s1421_s15, 2 }
  0x41   : > { %s1575_s9 = scalar_select %p25_p6, %s1417_s14, %s27_s23  }
  0x42   : > { %p1569_p5 = por %p1709_p3, %p34_p13  ;;  %p36_p9 = por %p35_p10, %p34_p13 }
  0x43   : > { %s158_s10 = sand.u32 1, %s1417_s14   ;;  %s859_s25 = sshll.u32 %s1421_s15, 7 }
  0x44   : > { %s1710_s6 = scalar_select %p1569_p5, 1, 0 }
  0x45   : > { %s847_s11 = sshll.u32 %s158_s10, 3  ;;  %s1582_s17 = scalar_lea.hbm %s1698_s0, %s859_s25 }
  0x46   : > { %s162_s21 = scalar_lea.vmem [#allocation2], %s847_s11  ;;  %p1586_p11 = pnand %p1224_p7, %p36_p9 }
  0x47   : > { %s170_s24 = sshll.u32 %s162_s21, 4  ;;  %s159_s27 = scalar_lea.sflag [#allocation3], %s158_s10  ;;  %s1584_s24 = int_to_ptr.vmem [resolvable:$true] %s170_s24 }
  0x48   : > { %s1321_s28 = scalar_lea.hbm %s1582_s17, 128  ;;  %p1323_p0 = pneg %p1586_p11 }
  0x49   : > { %p1322_p12 = scmp.ne.s32.totalorder %s1582_s17, %s1321_s28  ;;  %s1326_s30 = scalar_lea.hbm %s1698_s0, 256 }
  0x4a   : > { %p1327_p13 = scmp.lt.u32.totalorder %s1582_s17, %s1698_s0  ;;  %p1328_p6 = scmp.lt.u32.totalorder %s1326_s30, %s1321_s28 }
  0x4b   : > { %p1324_p2 = pnand %p1323_p0, %p1322_p12  ;;  %p1330_p3 = scmp.lt.u32.totalorder %s1321_s28, %s1582_s17 }
  0x4c   : > { %p1329_p10 = por %p1328_p6, %p1327_p13 }
  0x4d   : > { %p1325_p1 = pneg %p1324_p2 }
  0x4e   : > { %p1331_p7 = por %p1330_p3, %p1329_p10 }
  0x50   : > { %p1332_p9 = pnand %p1331_p7, %p1325_p1 }
  0x52   : > { %1335 = shalt.err (!%p1332_p9)
}
  0x53   : > { %s1336_s10 = scalar_lea.vmem %s1584_s24, 128  ;;  %s1427_s11 = smov [#allocation2]  }
  0x54   : > { %p1337_p12 = scmp.ne.s32.totalorder %s1584_s24, %s1336_s10  ;;  %s1341_s25 = sshll.u32 %s1427_s11, 4  ;;  %s1342_s25 = int_to_ptr.vmem [resolvable:$false] %s1341_s25 }
  0x55   : > { %s1343_s7 = scalar_lea.vmem %s1342_s25, 256  ;;  %p1344_p4 = scmp.lt.s32.totalorder %s1584_s24, %s1342_s25 }
  0x56   : > { %p1339_p2 = pnand %p1337_p12, %p1323_p0  ;;  %p1345_p13 = scmp.lt.s32.totalorder %s1343_s7, %s1336_s10 }
  0x58   : > { %p1340_p5 = pneg %p1339_p2  ;;  %p1346_p6 = por %p1345_p13, %p1344_p4 }
  0x5a   : > { %p1347_p10 = pnand %p1346_p6, %p1340_p5 }
  0x5c   : > { %1350 = shalt.err (!%p1347_p10)
}
  0x5d   : > { %1217 = dma.hbm_to_vmem [thread:$0]  (!%p1586_p11), %s1582_s17, 128, %s1584_s24, %s159_s27  }
  0x5e   : > { %179 = sbr.rel (%p1489_p8) target bundleno = 438 (0x1b6), region = 32  ;;  %s1618_s8 = sand.u32 (!%p1489_p8), 1, %s1413_s13  }
  0x5f   : > { %s851_s21 = sshll.u32 (!%p1489_p8), %s1618_s8, 3  ;;  %s182_s28 = scalar_lea.sflag (!%p1489_p8), [#allocation3], %s1618_s8 }
  0x60   : > { %s1622_s22 = scalar_lea.vmem (!%p1489_p8), [#allocation2], %s851_s21  ;;  %p1712_p4 = scmp.ne.s32.totalorder (!%p1489_p8), %s1705_s18, 0 }
  0x65   : > { %1396 = dma.done.wait (%p1712_p4), %s182_s28, 128  }
  0x66   : > { %1398 = vsyncadd (%p1712_p4), %s182_s28, 4294967168  ;;  %p1713_p5 = scmp.eq.s32.totalorder %s1470_s16, 0 }
  0x68   : > { %1400 = dma.done.wait (%p1713_p5), [#allocation6], 20480   ;;  %p1714_p8 = pmov %p1713_p5 }
  0x69   : > { %v233_v0 = vld [vmem:[#allocation7 + $0x80] sm:$0xff]  ;;  %v234_v1 = vld [vmem:[#allocation7 + $0x88] sm:$0xff]  ;;  %v235_v11 = vld [vmem:[#allocation7 + $0x90] sm:$0xff]  ;;  %s854_s18 = sshll.u32 %s1618_s8, 2  ;;  %s856_s20 = sshll.u32 %s1470_s16, 6 }
  0x6a   : > { %1402 = vsyncadd (%p1714_p8), [#allocation6], 4294946816  ;;  %v339_v2 = vld [vmem:[#allocation7 + $0x180] sm:$0xff]  ;;  %v1035_v3 = vpack.c.bf16 %v234_v1, %v233_v0  ;;  %v340_v4 = vld [vmem:[#allocation7 + $0x188] sm:$0xff]  ;;  %s215_s17 = scalar_lea.vmem [#allocation8], %s854_s18  ;;  %s1654_s29 = scalar_lea.hbm %s1701_s3, %s856_s20 }
  0x6b   : > { %v217_v5 = vld [vmem:[#allocation7] sm:$0xff]  ;;  %v218_v6 = vld [vmem:[#allocation7 + $0x8] sm:$0xff]  ;;  %v1067_v7 = vpack.c.bf16 %v340_v4, %v339_v2  ;;  %v236_v13 = vld [vmem:[#allocation7 + $0x98] sm:$0xff]  ;;  %s753_s24 = sshll.u32 %s215_s17, 4  ;;  %s740_s30 = scalar_lea.sflag [#allocation4], %s1618_s8  ;;  %s1656_s24 = int_to_ptr.vmem [resolvable:$true] %s753_s24 }
  0x6c   : > { %v1037_v8 = vpack.c.bf16 %v218_v6, %v217_v5  ;;  %v323_v9 = vld [vmem:[#allocation7 + $0x100] sm:$0xff]  ;;  %v324_v10 = vld [vmem:[#allocation7 + $0x108] sm:$0xff]  ;;  %1036 = vmatprep.subr.bf16.mxu0 %v1035_v3  ;;  %v341_v14 = vld [vmem:[#allocation7 + $0x190] sm:$0xff]  ;;  %v1039_v16 = vpack.c.bf16 %v236_v13, %v235_v11  ;;  %s1351_s23 = scalar_lea.vmem %s1656_s24, 64  ;;  %p1715_p0 = scmp.ne.s32.totalorder %s1710_s6, 0 }
  0x6d   : > { %v1069_v12 = vpack.c.bf16 %v324_v10, %v323_v9  ;;  %v342_v15 = vld [vmem:[#allocation7 + $0x198] sm:$0xff]  ;;  %1068 = vmatprep.subr.bf16.mxu1 %v1067_v7  ;;  %v219_v18 = vld [vmem:[#allocation7 + $0x10] sm:$0xff]  ;;  %v237_v23 = vld [vmem:[#allocation7 + $0xa0] sm:$0xff]  ;;  %p1352_p11 = scmp.ne.s32.totalorder %s1656_s24, %s1351_s23  ;;  %s1428_s16 = smov [#allocation8]  }
  0x6e   : > { %1038 = vmatpush3.bf16.msra.mxu0 %v1037_v8  ;;  %v1071_v17 = vpack.c.bf16 %v342_v15, %v341_v14  ;;  %v220_v19 = vld [vmem:[#allocation7 + $0x18] sm:$0xff]  ;;  %v325_v20 = vld [vmem:[#allocation7 + $0x110] sm:$0xff]  ;;  %v238_v24 = vld [vmem:[#allocation7 + $0xa8] sm:$0xff]  ;;  %s1355_s5 = sshll.u32 %s1428_s16, 4  ;;  %s1356_s5 = int_to_ptr.vmem [resolvable:$false] %s1355_s5 }
  0x6f   : > { %1070 = vmatpush3.bf16.msra.mxu1 %v1069_v12  ;;  %v1041_v21 = vpack.c.bf16 %v220_v19, %v219_v18  ;;  %v326_v22 = vld [vmem:[#allocation7 + $0x118] sm:$0xff]  ;;  %1040 = vmatprep.subr.bf16.mxu0 %v1039_v16  ;;  %v1043_v26 = vpack.c.bf16 %v238_v24, %v237_v23  ;;  %v343_v27 = vld [vmem:[#allocation7 + $0x1a0] sm:$0xff]  ;;  %v344_v28 = vld [vmem:[#allocation7 + $0x1a8] sm:$0xff]  ;;  %p1353_p1 = pnand %p1352_p11, %p1715_p0  ;;  %s1357_s10 = scalar_lea.vmem %s1356_s5, 128 }
  0x70   : > { %1072 = vmatprep.subr.bf16.mxu1 %v1071_v17  ;;  %v1073_v25 = vpack.c.bf16 %v326_v22, %v325_v20  ;;  %v221_v29 = vld [vmem:[#allocation7 + $0x20] sm:$0xff]  ;;  %v1075_v30 = vpack.c.bf16 %v344_v28, %v343_v27  ;;  %v222_v31 = vld [vmem:[#allocation7 + $0x28] sm:$0xff]  ;;  %v239_v35 = vld [vmem:[#allocation7 + $0xb0] sm:$0xff]  ;;  %p1358_p7 = scmp.lt.s32.totalorder %s1656_s24, %s1356_s5  ;;  %p1359_p9 = scmp.lt.s32.totalorder %s1357_s10, %s1351_s23 }
  0x71   : > { %v327_v32 = vld [vmem:[#allocation7 + $0x120] sm:$0xff]  ;;  %v328_v33 = vld [vmem:[#allocation7 + $0x128] sm:$0xff]  ;;  %v1045_v34 = vpack.c.bf16 %v222_v31, %v221_v29  ;;  %v240_v36 = vld [vmem:[#allocation7 + $0xb8] sm:$0xff]  ;;  %p1354_p3 = pneg %p1353_p1 }
  0x72   : > { %1042 = vmatpush3.bf16.msra.mxu0 %v1041_v21  ;;  %v345_v37 = vld [vmem:[#allocation7 + $0x1b0] sm:$0xff]  ;;  %v1077_v38 = vpack.c.bf16 %v328_v33, %v327_v32  ;;  %v1047_v39 = vpack.c.bf16 %v240_v36, %v239_v35  ;;  %v346_v40 = vld [vmem:[#allocation7 + $0x1b8] sm:$0xff]  ;;  %v241_v46 = vld [vmem:[#allocation7 + $0xc0] sm:$0xff]  ;;  %p1360_p12 = por %p1359_p9, %p1358_p7 }
  0x73   : > { %1074 = vmatpush3.bf16.msra.mxu1 %v1073_v25  ;;  %1044 = vmatprep.subr.bf16.mxu0 %v1043_v26  ;;  %v223_v41 = vld [vmem:[#allocation7 + $0x30] sm:$0xff]  ;;  %v224_v42 = vld [vmem:[#allocation7 + $0x38] sm:$0xff]  ;;  %v1079_v43 = vpack.c.bf16 %v346_v40, %v345_v37  ;;  %v242_v47 = vld [vmem:[#allocation7 + $0xc8] sm:$0xff] }
  0x74   : > { %1076 = vmatprep.subr.bf16.mxu1 %v1075_v30  ;;  %v329_v44 = vld [vmem:[#allocation7 + $0x130] sm:$0xff]  ;;  %v330_v45 = vld [vmem:[#allocation7 + $0x138] sm:$0xff]  ;;  %v347_v48 = vld [vmem:[#allocation7 + $0x1c0] sm:$0xff]  ;;  %v1049_v50 = vpack.c.bf16 %v224_v42, %v223_v41  ;;  %v1051_v52 = vpack.c.bf16 %v242_v47, %v241_v46  ;;  %p1361_p2 = pnand %p1360_p12, %p1354_p3 }
  0x75   : > { %v348_v49 = vld [vmem:[#allocation7 + $0x1c8] sm:$0xff]  ;;  %v1081_v51 = vpack.c.bf16 %v330_v45, %v329_v44  ;;  %v225_v53 = vld [vmem:[#allocation7 + $0x40] sm:$0xff]  ;;  %v243_v58 = vld [vmem:[#allocation7 + $0xd0] sm:$0xff] }
  0x76   : > { %1046 = vmatpush3.bf16.msra.mxu0 %v1045_v34  ;;  %v226_v54 = vld [vmem:[#allocation7 + $0x48] sm:$0xff]  ;;  %v331_v55 = vld [vmem:[#allocation7 + $0x140] sm:$0xff]  ;;  %v1083_v56 = vpack.c.bf16 %v348_v49, %v347_v48  ;;  %v244_v59 = vld [vmem:[#allocation7 + $0xd8] sm:$0xff] }
  0x77   : > { %1078 = vmatpush3.bf16.msra.mxu1 %v1077_v38  ;;  %1048 = vmatprep.subr.bf16.mxu0 %v1047_v39  ;;  %v332_v57 = vld [vmem:[#allocation7 + $0x148] sm:$0xff]  ;;  %v349_v60 = vld [vmem:[#allocation7 + $0x1d0] sm:$0xff]  ;;  %v350_v61 = vld [vmem:[#allocation7 + $0x1d8] sm:$0xff]  ;;  %v1053_v62 = vpack.c.bf16 %v226_v54, %v225_v53  ;;  %v1055_v0 = vpack.c.bf16 %v244_v59, %v243_v58 }
  0x78   : > { %1080 = vmatprep.subr.bf16.mxu1 %v1079_v43  ;;  %v1085_v63 = vpack.c.bf16 %v332_v57, %v331_v55  ;;  %v227_v1 = vld [vmem:[#allocation7 + $0x50] sm:$0xff]  ;;  %v228_v2 = vld [vmem:[#allocation7 + $0x58] sm:$0xff]  ;;  %v1087_v4 = vpack.c.bf16 %v350_v61, %v349_v60  ;;  %v245_v6 = vld [vmem:[#allocation7 + $0xe0] sm:$0xff] }
  0x79   : > { %v333_v3 = vld [vmem:[#allocation7 + $0x150] sm:$0xff]  ;;  %v334_v5 = vld [vmem:[#allocation7 + $0x158] sm:$0xff]  ;;  %v246_v7 = vld [vmem:[#allocation7 + $0xe8] sm:$0xff]  ;;  %v1057_v10 = vpack.c.bf16 %v228_v2, %v227_v1 }
  0x7a   : > { %1050 = vmatpush3.bf16.msra.mxu0 %v1049_v50  ;;  %v351_v8 = vld [vmem:[#allocation7 + $0x1e0] sm:$0xff]  ;;  %v352_v9 = vld [vmem:[#allocation7 + $0x1e8] sm:$0xff]  ;;  %v1089_v12 = vpack.c.bf16 %v334_v5, %v333_v3  ;;  %v1059_v13 = vpack.c.bf16 %v246_v7, %v245_v6  ;;  %v1633_v16 = vld [vmem:[%s1622_s22] sm:$0xff] }
  0x7b   : > { %1082 = vmatpush3.bf16.msra.mxu1 %v1081_v51  ;;  %1052 = vmatprep.subr.bf16.mxu0 %v1051_v52  ;;  %v229_v11 = vld [vmem:[#allocation7 + $0x60] sm:$0xff]  ;;  %v230_v14 = vld [vmem:[#allocation7 + $0x68] sm:$0xff]  ;;  %v1091_v17 = vpack.c.bf16 %v352_v9, %v351_v8  ;;  %v247_v19 = vld [vmem:[#allocation7 + $0xf0] sm:$0xff]  ;;  %v1637_v21 = vcombine.high %v1633_v16, %v1633_v16 }
  0x7c   : > { %1084 = vmatprep.subr.bf16.mxu1 %v1083_v56  ;;  %v335_v15 = vld [vmem:[#allocation7 + $0x160] sm:$0xff]  ;;  %v336_v18 = vld [vmem:[#allocation7 + $0x168] sm:$0xff]  ;;  %v248_v20 = vld [vmem:[#allocation7 + $0xf8] sm:$0xff]  ;;  %v1061_v24 = vpack.c.bf16 %v230_v14, %v229_v11 }
  0x7d   : > { %v353_v22 = vld [vmem:[#allocation7 + $0x1f0] sm:$0xff]  ;;  %v354_v23 = vld [vmem:[#allocation7 + $0x1f8] sm:$0xff]  ;;  %316 = vmatprep.mubr.f32.mxu0 %v1637_v21  ;;  %v1093_v25 = vpack.c.bf16 %v336_v18, %v335_v15  ;;  %v1063_v26 = vpack.c.bf16 %v248_v20, %v247_v19  ;;  %419 = vmatprep.mubr.f32.mxu1 %v1637_v21  ;;  %v443_v32 = vld [vmem:[#allocation7 + $0x280] sm:$0xff] }
  0x7e   : > { %1054 = vmatpush3.bf16.msra.mxu0 %v1053_v62  ;;  %v231_v27 = vld [vmem:[#allocation7 + $0x70] sm:$0xff]  ;;  %v232_v28 = vld [vmem:[#allocation7 + $0x78] sm:$0xff]  ;;  %v1095_v30 = vpack.c.bf16 %v354_v23, %v353_v22  ;;  %v444_v33 = vld [vmem:[#allocation7 + $0x288] sm:$0xff] }
  0x7f   : > { %1086 = vmatpush3.bf16.msra.mxu1 %v1085_v63  ;;  %1056 = vmatprep.subr.bf16.mxu0 %v1055_v0  ;;  %v337_v29 = vld [vmem:[#allocation7 + $0x170] sm:$0xff]  ;;  %v338_v31 = vld [vmem:[#allocation7 + $0x178] sm:$0xff]  ;;  %v547_v34 = vld [vmem:[#allocation7 + $0x380] sm:$0xff]  ;;  %v1065_v36 = vpack.c.bf16 %v232_v28, %v231_v27  ;;  %v1099_v38 = vpack.c.bf16 %v444_v33, %v443_v32 }
  0x80   : > { %1088 = vmatprep.subr.bf16.mxu1 %v1087_v4  ;;  %v548_v35 = vld [vmem:[#allocation7 + $0x388] sm:$0xff]  ;;  %v1097_v37 = vpack.c.bf16 %v338_v31, %v337_v29  ;;  %v427_v39 = vld [vmem:[#allocation7 + $0x200] sm:$0xff]  ;;  %v445_v44 = vld [vmem:[#allocation7 + $0x290] sm:$0xff] }
  0x81   : > { %v428_v40 = vld [vmem:[#allocation7 + $0x208] sm:$0xff]  ;;  %v531_v41 = vld [vmem:[#allocation7 + $0x300] sm:$0xff]  ;;  %v1131_v42 = vpack.c.bf16 %v548_v35, %v547_v34  ;;  %v446_v45 = vld [vmem:[#allocation7 + $0x298] sm:$0xff] }
  0x82   : > { %1058 = vmatpush3.bf16.msra.mxu0 %v1057_v10  ;;  %v532_v43 = vld [vmem:[#allocation7 + $0x308] sm:$0xff]  ;;  %v549_v46 = vld [vmem:[#allocation7 + $0x390] sm:$0xff]  ;;  %v550_v47 = vld [vmem:[#allocation7 + $0x398] sm:$0xff]  ;;  %v1101_v48 = vpack.c.bf16 %v428_v40, %v427_v39  ;;  %v1103_v50 = vpack.c.bf16 %v446_v45, %v445_v44 }
  0x83   : > { %1090 = vmatpush3.bf16.msra.mxu1 %v1089_v12  ;;  %1060 = vmatprep.subr.bf16.mxu0 %v1059_v13  ;;  %v1133_v49 = vpack.c.bf16 %v532_v43, %v531_v41  ;;  %v429_v51 = vld [vmem:[#allocation7 + $0x210] sm:$0xff]  ;;  %v430_v52 = vld [vmem:[#allocation7 + $0x218] sm:$0xff]  ;;  %v1135_v54 = vpack.c.bf16 %v550_v47, %v549_v46  ;;  %v447_v56 = vld [vmem:[#allocation7 + $0x2a0] sm:$0xff] }
  0x84   : > { %1092 = vmatprep.subr.bf16.mxu1 %v1091_v17  ;;  %v533_v53 = vld [vmem:[#allocation7 + $0x310] sm:$0xff]  ;;  %v534_v55 = vld [vmem:[#allocation7 + $0x318] sm:$0xff]  ;;  %v448_v57 = vld [vmem:[#allocation7 + $0x2a8] sm:$0xff]  ;;  %v1105_v60 = vpack.c.bf16 %v430_v52, %v429_v51 }
  0x85   : > { %v551_v58 = vld [vmem:[#allocation7 + $0x3a0] sm:$0xff]  ;;  %v552_v59 = vld [vmem:[#allocation7 + $0x3a8] sm:$0xff]  ;;  %v1137_v61 = vpack.c.bf16 %v534_v55, %v533_v53  ;;  %v1107_v62 = vpack.c.bf16 %v448_v57, %v447_v56  ;;  %v449_v4 = vld [vmem:[#allocation7 + $0x2b0] sm:$0xff] }
  0x86   : > { %1062 = vmatpush3.bf16.msra.mxu0 %v1061_v24  ;;  %v431_v63 = vld [vmem:[#allocation7 + $0x220] sm:$0xff]  ;;  %v432_v0 = vld [vmem:[#allocation7 + $0x228] sm:$0xff]  ;;  %v1139_v2 = vpack.c.bf16 %v552_v59, %v551_v58  ;;  %v450_v5 = vld [vmem:[#allocation7 + $0x2b8] sm:$0xff] }
  0x87   : > { %1094 = vmatpush3.bf16.msra.mxu1 %v1093_v25  ;;  %1064 = vmatprep.subr.bf16.mxu0 %v1063_v26  ;;  %v535_v1 = vld [vmem:[#allocation7 + $0x320] sm:$0xff]  ;;  %v536_v3 = vld [vmem:[#allocation7 + $0x328] sm:$0xff]  ;;  %v553_v6 = vld [vmem:[#allocation7 + $0x3b0] sm:$0xff]  ;;  %v1109_v8 = vpack.c.bf16 %v432_v0, %v431_v63  ;;  %v1111_v10 = vpack.c.bf16 %v450_v5, %v449_v4 }
  0x88   : > { %1096 = vmatprep.subr.bf16.mxu1 %v1095_v30  ;;  %v554_v7 = vld [vmem:[#allocation7 + $0x3b8] sm:$0xff]  ;;  %v1141_v9 = vpack.c.bf16 %v536_v3, %v535_v1  ;;  %v433_v11 = vld [vmem:[#allocation7 + $0x230] sm:$0xff]  ;;  %v451_v17 = vld [vmem:[#allocation7 + $0x2c0] sm:$0xff] }
  0x89   : > { %v434_v12 = vld [vmem:[#allocation7 + $0x238] sm:$0xff]  ;;  %v537_v13 = vld [vmem:[#allocation7 + $0x330] sm:$0xff]  ;;  %v1143_v14 = vpack.c.bf16 %v554_v7, %v553_v6  ;;  %v452_v18 = vld [vmem:[#allocation7 + $0x2c8] sm:$0xff] }
  0x8a   : > { %1066 = vmatpush3.bf16.msra.mxu0 %v1065_v36  ;;  %v538_v15 = vld [vmem:[#allocation7 + $0x338] sm:$0xff]  ;;  %v555_v19 = vld [vmem:[#allocation7 + $0x3c0] sm:$0xff]  ;;  %v556_v20 = vld [vmem:[#allocation7 + $0x3c8] sm:$0xff]  ;;  %v1113_v22 = vpack.c.bf16 %v434_v12, %v433_v11  ;;  %v1115_v24 = vpack.c.bf16 %v452_v18, %v451_v17 }
  0x8b   : > { %1098 = vmatpush3.bf16.msra.mxu1 %v1097_v37  ;;  %1100 = vmatprep.subr.bf16.mxu0 %v1099_v38  ;;  %v1145_v23 = vpack.c.bf16 %v538_v15, %v537_v13  ;;  %v435_v25 = vld [vmem:[#allocation7 + $0x240] sm:$0xff]  ;;  %v436_v26 = vld [vmem:[#allocation7 + $0x248] sm:$0xff]  ;;  %v1147_v28 = vpack.c.bf16 %v556_v20, %v555_v19  ;;  %v453_v30 = vld [vmem:[#allocation7 + $0x2d0] sm:$0xff] }
  0x8c   : > { %1132 = vmatprep.subr.bf16.mxu1 %v1131_v42  ;;  %v539_v27 = vld [vmem:[#allocation7 + $0x340] sm:$0xff]  ;;  %v540_v29 = vld [vmem:[#allocation7 + $0x348] sm:$0xff]  ;;  %v454_v31 = vld [vmem:[#allocation7 + $0x2d8] sm:$0xff]  ;;  %v1117_v34 = vpack.c.bf16 %v436_v26, %v435_v25 }
  0x8d   : > { %317 = vmatmul.mubr.f32.vlgmr.msra.gmra.mrb[0].mxu0 %v1633_v16  ;;  %v557_v32 = vld [vmem:[#allocation7 + $0x3d0] sm:$0xff]  ;;  %v558_v33 = vld [vmem:[#allocation7 + $0x3d8] sm:$0xff]  ;;  %v1149_v35 = vpack.c.bf16 %v540_v29, %v539_v27  ;;  %v1119_v36 = vpack.c.bf16 %v454_v31, %v453_v30  ;;  %v455_v42 = vld [vmem:[#allocation7 + $0x2e0] sm:$0xff] }
  0x8e   : > { %420 = vmatmul.mubr.f32.vlgmr.msra.gmra.mrb[0].mxu1 %v1633_v16  ;;  %1102 = vmatpush3.bf16.msra.mxu0 %v1101_v48  ;;  %v437_v37 = vld [vmem:[#allocation7 + $0x250] sm:$0xff]  ;;  %v438_v38 = vld [vmem:[#allocation7 + $0x258] sm:$0xff]  ;;  %v1151_v40 = vpack.c.bf16 %v558_v33, %v557_v32  ;;  %v456_v43 = vld [vmem:[#allocation7 + $0x2e8] sm:$0xff] }
  0x8f   : > { %1134 = vmatpush3.bf16.msra.mxu1 %v1133_v49  ;;  %1104 = vmatprep.subr.bf16.mxu0 %v1103_v50  ;;  %v541_v39 = vld [vmem:[#allocation7 + $0x350] sm:$0xff]  ;;  %v542_v41 = vld [vmem:[#allocation7 + $0x358] sm:$0xff]  ;;  %v559_v44 = vld [vmem:[#allocation7 + $0x3e0] sm:$0xff]  ;;  %v1121_v46 = vpack.c.bf16 %v438_v38, %v437_v37  ;;  %v1123_v48 = vpack.c.bf16 %v456_v43, %v455_v42 }
  0x90   : > { %1136 = vmatprep.subr.bf16.mxu1 %v1135_v54  ;;  %523 = vmatprep.mubr.f32.mxu0 %v1637_v21  ;;  %v560_v45 = vld [vmem:[#allocation7 + $0x3e8] sm:$0xff]  ;;  %v1153_v47 = vpack.c.bf16 %v542_v41, %v541_v39  ;;  %v439_v49 = vld [vmem:[#allocation7 + $0x260] sm:$0xff]  ;;  %v457_v54 = vld [vmem:[#allocation7 + $0x2f0] sm:$0xff] }
  0x91   : > { %627 = vmatprep.mubr.f32.mxu1 %v1637_v21  ;;  %v440_v50 = vld [vmem:[#allocation7 + $0x268] sm:$0xff]  ;;  %v543_v51 = vld [vmem:[#allocation7 + $0x360] sm:$0xff]  ;;  %v1155_v52 = vpack.c.bf16 %v560_v45, %v559_v44  ;;  %v458_v55 = vld [vmem:[#allocation7 + $0x2f8] sm:$0xff] }
  0x92   : > { %1106 = vmatpush3.bf16.msra.mxu0 %v1105_v60  ;;  %v544_v53 = vld [vmem:[#allocation7 + $0x368] sm:$0xff]  ;;  %v561_v56 = vld [vmem:[#allocation7 + $0x3f0] sm:$0xff]  ;;  %v562_v57 = vld [vmem:[#allocation7 + $0x3f8] sm:$0xff]  ;;  %v1125_v58 = vpack.c.bf16 %v440_v50, %v439_v49  ;;  %v1127_v60 = vpack.c.bf16 %v458_v55, %v457_v54 }
  0x93   : > { %1138 = vmatpush3.bf16.msra.mxu1 %v1137_v61  ;;  %1108 = vmatprep.subr.bf16.mxu0 %v1107_v62  ;;  %v1157_v59 = vpack.c.bf16 %v544_v53, %v543_v51  ;;  %v441_v61 = vld [vmem:[#allocation7 + $0x270] sm:$0xff]  ;;  %v442_v62 = vld [vmem:[#allocation7 + $0x278] sm:$0xff]  ;;  %v1159_v0 = vpack.c.bf16 %v562_v57, %v561_v56  ;;  %v651_v3 = vld [vmem:[#allocation5 + $0x88] sm:$0xff] }
  0x94   : > { %1140 = vmatprep.subr.bf16.mxu1 %v1139_v2  ;;  %v545_v63 = vld [vmem:[#allocation7 + $0x370] sm:$0xff]  ;;  %v546_v1 = vld [vmem:[#allocation7 + $0x378] sm:$0xff]  ;;  %v650_v2 = vld [vmem:[#allocation5 + $0x80] sm:$0xff]  ;;  %v1129_v4 = vpack.c.bf16 %v442_v62, %v441_v61 }
  0x95   : > { %v1161_v5 = vpack.c.bf16 %v546_v1, %v545_v63  ;;  %v1163_v6 = vpack.c.bf16 %v651_v3, %v650_v2  ;;  %v634_v7 = vld [vmem:[#allocation5] sm:$0xff]  ;;  %v636_v13 = vld [vmem:[#allocation5 + $0x10] sm:$0xff]  ;;  %v655_v17 = vld [vmem:[#allocation5 + $0xa8] sm:$0xff] }
  0x96   : > { %1110 = vmatpush3.bf16.msra.mxu0 %v1109_v8  ;;  %v635_v8 = vld [vmem:[#allocation5 + $0x8] sm:$0xff]  ;;  %v654_v15 = vld [vmem:[#allocation5 + $0xa0] sm:$0xff]  ;;  %v640_v27 = vld [vmem:[#allocation5 + $0x30] sm:$0xff] }
  0x97   : > { %1142 = vmatpush3.bf16.msra.mxu1 %v1141_v9  ;;  %1112 = vmatprep.subr.bf16.mxu0 %v1111_v10  ;;  %v652_v9 = vld [vmem:[#allocation5 + $0x90] sm:$0xff]  ;;  %v653_v10 = vld [vmem:[#allocation5 + $0x98] sm:$0xff]  ;;  %v1165_v11 = vpack.c.bf16 %v635_v8, %v634_v7  ;;  %v1171_v19 = vpack.c.bf16 %v655_v17, %v654_v15  ;;  %v638_v20 = vld [vmem:[#allocation5 + $0x20] sm:$0xff] }
  0x98   : > { %1144 = vmatprep.subr.bf16.mxu1 %v1143_v14  ;;  %v1167_v12 = vpack.c.bf16 %v653_v10, %v652_v9  ;;  %v637_v14 = vld [vmem:[#allocation5 + $0x18] sm:$0xff]  ;;  %v658_v29 = vld [vmem:[#allocation5 + $0xc0] sm:$0xff]  ;;  %v659_v30 = vld [vmem:[#allocation5 + $0xc8] sm:$0xff] }
  0x99   : > { %v1169_v18 = vpack.c.bf16 %v637_v14, %v636_v13  ;;  %v1179_v32 = vpack.c.bf16 %v659_v30, %v658_v29  ;;  %v642_v33 = vld [vmem:[#allocation5 + $0x40] sm:$0xff]  ;;  %v644_v38 = vld [vmem:[#allocation5 + $0x50] sm:$0xff]  ;;  %v645_v39 = vld [vmem:[#allocation5 + $0x58] sm:$0xff] }
  0x9a   : > { %1114 = vmatpush3.bf16.msra.mxu0 %v1113_v22  ;;  %v639_v22 = vld [vmem:[#allocation5 + $0x28] sm:$0xff]  ;;  %v1185_v42 = vpack.c.bf16 %v645_v39, %v644_v38  ;;  %v646_v44 = vld [vmem:[#allocation5 + $0x60] sm:$0xff]  ;;  %v648_v50 = vld [vmem:[#allocation5 + $0x70] sm:$0xff] }
  0x9b   : > { %1146 = vmatpush3.bf16.msra.mxu1 %v1145_v23  ;;  %1116 = vmatprep.subr.bf16.mxu0 %v1115_v24  ;;  %v656_v23 = vld [vmem:[#allocation5 + $0xb0] sm:$0xff]  ;;  %v657_v24 = vld [vmem:[#allocation5 + $0xb8] sm:$0xff]  ;;  %v1173_v25 = vpack.c.bf16 %v639_v22, %v638_v20  ;;  %v663_v41 = vld [vmem:[#allocation5 + $0xe8] sm:$0xff] }
  0x9c   : > { %1148 = vmatprep.subr.bf16.mxu1 %v1147_v28  ;;  %v1175_v26 = vpack.c.bf16 %v657_v24, %v656_v23  ;;  %v641_v28 = vld [vmem:[#allocation5 + $0x38] sm:$0xff]  ;;  %v647_v45 = vld [vmem:[#allocation5 + $0x68] sm:$0xff] }
  0x9d   : > { %v1177_v31 = vpack.c.bf16 %v641_v28, %v640_v27  ;;  %v649_v51 = vld [vmem:[#allocation5 + $0x78] sm:$0xff] }
  0x9e   : > { %1118 = vmatpush3.bf16.msra.mxu0 %v1117_v34  ;;  %v643_v34 = vld [vmem:[#allocation5 + $0x48] sm:$0xff] }
  0x9f   : > { %1150 = vmatpush3.bf16.msra.mxu1 %v1149_v35  ;;  %1120 = vmatprep.subr.bf16.mxu0 %v1119_v36  ;;  %v660_v35 = vld [vmem:[#allocation5 + $0xd0] sm:$0xff]  ;;  %v661_v36 = vld [vmem:[#allocation5 + $0xd8] sm:$0xff] }
  0xa0   : > { %1152 = vmatprep.subr.bf16.mxu1 %v1151_v40  ;;  %v1183_v37 = vpack.c.bf16 %v661_v36, %v660_v35  ;;  %v662_v40 = vld [vmem:[#allocation5 + $0xe0] sm:$0xff] }
  0xa1   : > { %v1187_v43 = vpack.c.bf16 %v663_v41, %v662_v40 }
  0xa2   : > { %1122 = vmatpush3.bf16.msra.mxu0 %v1121_v46  ;;  %v664_v46 = vld [vmem:[#allocation5 + $0xf0] sm:$0xff] }
  0xa3   : > { %1154 = vmatpush3.bf16.msra.mxu1 %v1153_v47  ;;  %1124 = vmatprep.subr.bf16.mxu0 %v1123_v48  ;;  %v665_v47 = vld [vmem:[#allocation5 + $0xf8] sm:$0xff]  ;;  %v1189_v48 = vpack.c.bf16 %v647_v45, %v646_v44 }
  0xa4   : > { %1156 = vmatprep.subr.bf16.mxu1 %v1155_v52  ;;  %v1191_v49 = vpack.c.bf16 %v665_v47, %v664_v46  ;;  %v1193_v52 = vpack.c.bf16 %v649_v51, %v648_v50 }
  0xa6   : > { %1126 = vmatpush3.bf16.msra.mxu0 %v1125_v58 }
  0xa7   : > { %1158 = vmatpush3.bf16.msra.mxu1 %v1157_v59  ;;  %1128 = vmatprep.subr.bf16.mxu0 %v1127_v60 }
  0xa8   : > { %1160 = vmatprep.subr.bf16.mxu1 %v1159_v0 }
  0xaa   : > { %1130 = vmatpush3.bf16.msra.mxu0 %v1129_v4 }
  0xab   : > { %1162 = vmatpush3.bf16.msra.mxu1 %v1161_v5  ;;  %1164 = vmatprep.subr.bf16.mxu0 %v1163_v6 }
  0xad   : > { %524 = vmatmul.mubr.f32.vlgmr.msra.gmra.mrb[2].mxu0 %v1633_v16 }
  0xae   : > { %1166 = vmatpush3.bf16.msra.mxu0 %v1165_v11  ;;  %628 = vmatmul.mubr.f32.vlgmr.msra.gmra.mrb[2].mxu1 %v1633_v16 }
  0xaf   : > { %1168 = vmatprep.subr.bf16.mxu0 %v1167_v12  ;;  %730 = vmatprep.mubr.f32.mxu0 %v1637_v21  ;;  %v1181_v21 = vpack.c.bf16 %v643_v34, %v642_v33 }
  0xb2   : > { %1170 = vmatpush3.bf16.msra.mxu0 %v1169_v18 }
  0xb3   : > { %1172 = vmatprep.subr.bf16.mxu0 %v1171_v19 }
  0xb6   : > { %1174 = vmatpush3.bf16.msra.mxu0 %v1173_v25 }
  0xb7   : > { %1176 = vmatprep.subr.bf16.mxu0 %v1175_v26 }
  0xba   : > { %1178 = vmatpush3.bf16.msra.mxu0 %v1177_v31 }
  0xbb   : > { %1180 = vmatprep.subr.bf16.mxu0 %v1179_v32 }
  0xbe   : > { %1182 = vmatpush3.bf16.msra.mxu0 %v1181_v21 }
  0xbf   : > { %1184 = vmatprep.subr.bf16.mxu0 %v1183_v37 }
  0xc2   : > { %1186 = vmatpush3.bf16.msra.mxu0 %v1185_v42 }
  0xc3   : > { %1188 = vmatprep.subr.bf16.mxu0 %v1187_v43 }
  0xc6   : > { %1190 = vmatpush3.bf16.msra.mxu0 %v1189_v48 }
  0xc7   : > { %1192 = vmatprep.subr.bf16.mxu0 %v1191_v49 }
  0xca   : > { %1194 = vmatpush3.bf16.msra.mxu0 %v1193_v52 }
  0xcd   : > { %731 = vmatmul.mubr.f32.vlgmr.msra.gmra.mrb[4].mxu0 %v1633_v16 }
 0x160   : > { %v892_v53 = vpop.f32.mrb[0].mxu0 }
 0x161   : > { %v927_v54 = vpop.f32.mrb[0].mxu1  ;;  %v893_v55 = vpop.f32.mrb[1].mxu0 }
 0x162   : > { %v894_v56 = vadd.f32 %v893_v55, %v892_v53  ;;  %v928_v57 = vpop.f32.mrb[1].mxu1 }
 0x163   : > { %v929_v58 = vadd.f32 %v928_v57, %v927_v54 }
 0x165   : > { %v425_v59 = vmax.f32 %v894_v56, %v929_v58 }
 0x180   : > { %v962_v60 = vpop.f32.mrb[2].mxu0 }
 0x181   : > { %v963_v61 = vpop.f32.mrb[3].mxu0  ;;  %v997_v62 = vpop.f32.mrb[2].mxu1 }
 0x182   : > { %v964_v63 = vadd.f32 %v963_v61, %v962_v60  ;;  %v998_v0 = vpop.f32.mrb[3].mxu1 }
 0x183   : > { %v999_v1 = vadd.f32 %v998_v0, %v997_v62 }
 0x184   : > { %v529_v2 = vmax.f32 %v425_v59, %v964_v63 }
 0x186   : > { %v633_v3 = vmax.f32 %v529_v2, %v999_v1 }
 0x1a0   : > { %v1032_v16 = vpop.f32.mrb[4].mxu0 }
 0x1a1   : > { %v1033_v4 = vpop.f32.mrb[5].mxu0 }
 0x1a2   : > { %v1034_v5 = vadd.f32 %v1033_v4, %v1032_v16 }
 0x1a4   : > { %v736_v6 = vmul.f32 0.25, %v1034_v5 }
 0x1a6   : > { %v737_v7 = vadd.f32 %v736_v6, %v633_v3 }
 0x1a8   : > { %738 = vst [vmem:[%s215_s17] sm:$0xf] %v737_v7 }
 0x1a9   : > { %1364 = shalt.err (!%p1361_p2)
}
 0x1aa   : > { %s1365_s11 = scalar_lea.hbm %s1654_s29, 64  ;;  %s1369_s8 = scalar_lea.hbm %s1701_s3, 128 }
 0x1ab   : > { %p1366_p13 = scmp.ne.s32.totalorder %s1654_s29, %s1365_s11  ;;  %p1370_p4 = scmp.lt.u32.totalorder %s1654_s29, %s1701_s3 }
 0x1ac   : > { %p1371_p5 = scmp.lt.u32.totalorder %s1369_s8, %s1365_s11  ;;  %p1373_p11 = scmp.lt.u32.totalorder %s1365_s11, %s1654_s29 }
 0x1ad   : > { %p1367_p6 = pnand %p1366_p13, %p1715_p0 }
 0x1ae   : > { %p1372_p8 = por %p1371_p5, %p1370_p4 }
 0x1af   : > { %p1368_p10 = pneg %p1367_p6 }
 0x1b0   : > { %p1374_p1 = por %p1373_p11, %p1372_p8 }
 0x1b2   : > { %p1375_p3 = pnand %p1374_p1, %p1368_p10 }
 0x1b4   : > { %1378 = shalt.err (!%p1375_p3)
}
 0x1b5   : > { %1205 = dma.vmem_to_hbm [thread:$0]  (%p1715_p0), %s1656_s24, 64, %s1654_s29, %s740_s30  }
 0x1b6 PF: > { %s765_s22 = sand.u32 1, %s1409_s12   ;;  %p1716_p7 = scmp.ne.s32.totalorder %s1706_s19, 0 }
 0x1b7   : > { %p1717_p9 = scmp.ge.s32.totalorder %s1421_s15, 2  ;;  %s766_s18 = scalar_lea.sflag [#allocation4], %s765_s22 }
 0x1b9   : > { %p1219_p12 = pnand %p1717_p9, %p1716_p7 }
 0x1bb   : > { %1404 = dma.done.wait (!%p1219_p12), %s766_s18, 64  }
 0x1bc   : > { %1406 = vsyncadd (!%p1219_p12), %s766_s18, 4294967232  ;;  %p17_p2 = scmp.ge.s32.totalorder %s1559_s4, 4   ;;  %s1718_s12 = smov %s1413_s13 }
 0x1bd   : > { %s1719_s13 = smov %s1417_s14  ;;  %s1720_s14 = smov %s1575_s9 }
 0x1be   : > { %s1721_s15 = smov %s1559_s4  ;;  %19 = sbr.rel (!%p17_p2) target bundleno = 6 (0x6), region = 88 }
 0x1c5   :  { %771 = vsyncpa [#allocation3], 1 }
 0x1c6   :  { %773 = vsyncpa [#allocation3 + $0x1], 1 }
 0x1c7   :  { %774 = vsyncpa [#allocation6], 1 }
 0x1c8   :  { %775 = vsyncpa [#allocation4], 1 }
 0x1c9   :  { %777 = vsyncpa [#allocation4 + $0x1], 1 }

</bundles_post_ra>
